<compile_context>
chip_gen: v7x
topology: tpu7x:2x2x1
jax: 0.10.0
libtpu: 0.0.40
codegen_flags: <defaults>
</compile_context>

<pallas_src>
import functools
import math

import jax
import jax.numpy as jnp
from jax.experimental import pallas as pl
from jax.experimental.pallas import tpu as pltpu

_LANES = 128


def _wce_partials_kernel(x_ref, t_ref, s_ref, a_ref, *, ignore_index):
    """Per-block partial statistics for weighted cross entropy.

    x_ref: (1, C, Rc, L) logits tile (any float dtype)
    t_ref: (1, Rc, L)    int32 target tile (padded entries == ignore_index)
    s_ref: (1, 1, C, L)  partial per-class softmax mass          (lane partials)
    a_ref: (1, 1, C, L)  partial per-class sum of -logp@target   (lane partials)
    """
    x = x_ref[0].astype(jnp.float32)          # (C, Rc, L)
    t = t_ref[0]                              # (Rc, L) int32

    # Softmax / log-softmax over the class axis (outer dim -> pure VPU work,
    # no cross-lane traffic).  Division replaced by one EUP reciprocal per
    # position + a multiply per logit.
    m = jnp.max(x, axis=0)                    # (Rc, L)
    xs = x - m[None]
    e = jnp.exp(xs)
    z = jnp.sum(e, axis=0)                    # (Rc, L)
    inv_z = pl.reciprocal(z, approx=False)    # exact; approx=True would perturb the class weights
    probs = e * inv_z[None]                   # (C, Rc, L)
    logz = jnp.log(z)                         # (Rc, L)

    # Target hit mask over the class axis; iota is only (C, 1, L) (broadcast in
    # the compare), ignore_index (and padded) positions are masked out.
    classes = jax.lax.broadcasted_iota(jnp.int32, (x.shape[0], 1, x.shape[2]), 0)
    hit = (classes == t[None]) & (t[None] != ignore_index)      # (C, Rc, L)

    # Reduce only over the sublane (row) axis (XLU); lane axis kept so output
    # stores are lane-dense.  Cross-lane/cross-block reduce happens in JAX.
    s_ref[0, 0] = jnp.sum(probs, axis=1)                                   # (C, L)
    a_ref[0, 0] = jnp.sum(jnp.where(hit, logz[None] - xs, 0.0), axis=1)    # (C, L)


def _ceil_div(a, b):
    return -(-a // b)


def _round_up(a, m):
    return _ceil_div(a, m) * m


def _choose_row_chunking(n_rows, bytes_per_row, live_budget_bytes,
                         min_total_steps, batch):
    """Pick (Rc, G, R_pad): Rc rows per block, G blocks, padded row count.

    Rc is either the full row extent (G == 1, always block-legal) or a multiple
    of 8 (so the (Rc, 128) block satisfies the (8, 128) rule after padding rows
    to R_pad = G * Rc).
    """
    cap_rows = max(1, live_budget_bytes // max(1, bytes_per_row))
    g_vmem = _ceil_div(n_rows, cap_rows)
    g_par = 1
    if n_rows >= 16:
        # Aim for >= min_total_steps grid steps overall (megacore / pipelining),
        # but never make chunks smaller than 8 rows.
        g_par = max(1, min(_ceil_div(min_total_steps, max(1, batch)), n_rows // 8))
    g = max(g_vmem, g_par)
    if g <= 1:
        return n_rows, 1, n_rows                       # full extent, no padding
    rc = _round_up(_ceil_div(n_rows, g), 8)
    cap8 = max(8, (cap_rows // 8) * 8)
    rc = min(rc, cap8)
    g = _ceil_div(n_rows, rc)
    return rc, g, rc * g


def weighted_cross_entropy_loss(logits, target, ignore_index=-1, *,
                                live_vmem_budget_bytes=24 * 1024 * 1024,
                                vmem_limit_bytes=48 * 1024 * 1024,
                                min_total_grid_steps=8):
    """Forward pass of PyTorch WeightedCrossEntropyLoss as a Pallas TPU kernel.

    logits: (N, C, *spatial) float array
    target: (N, *spatial)    integer class indices (entries == ignore_index skipped)
    returns: scalar float32 loss
    NOTE: if every target equals ignore_index the result is NaN (0/0), same as PyTorch.
    """
    N, C = int(logits.shape[0]), int(logits.shape[1])
    spatial = tuple(int(d) for d in logits.shape[2:])
    P = int(math.prod(spatial)) if spatial else 1
    assert target.shape == (N,) + spatial, (logits.shape, target.shape)

    L = _LANES
    R = _ceil_div(P, L)                        # lane-dense rows per sample (pre row-padding)

    # Conservative live-set bytes per row of a block: double-buffered logits +
    # targets, ~5 full-size f32 (C, Rc, L) temporaries (f32 upcast/xs, e, probs,
    # where-product, slack) and ~4 (Rc, L) f32 temporaries.
    itemsize = int(jnp.dtype(logits.dtype).itemsize)
    f32 = 4
    bytes_per_row = L * (C * (2 * itemsize + 5 * f32) + 2 * 4 + 4 * f32)
    Rc, G, R_pad = _choose_row_chunking(R, bytes_per_row, live_vmem_budget_bytes,
                                        min_total_grid_steps, N)
    P_pad = R_pad * L

    x = logits.reshape(N, C, P)
    t = target.reshape(N, P).astype(jnp.int32)
    if P_pad != P:
        # Pad positions: zero logits (uniform softmax, mass removed in the
        # epilogue) and ignore_index targets (never hit).  One extra HBM copy,
        # only when the shape actually needs padding.
        x = jnp.pad(x, ((0, 0), (0, 0), (0, P_pad - P)))
        t = jnp.pad(t, ((0, 0), (0, P_pad - P)), constant_values=ignore_index)
    x = x.reshape(N, C, R_pad, L)
    t = t.reshape(N, R_pad, L)

    out_sds = jax.ShapeDtypeStruct((N, G, C, L), jnp.float32)
    out_spec = pl.BlockSpec((1, 1, C, L), lambda n, g: (n, g, 0, 0))

    n_logit = N * C * P_pad
    n_pos = N * P_pad
    cost = pl.CostEstimate(
        flops=8 * n_logit + 4 * n_pos,
        transcendentals=n_logit + 2 * n_pos,
        bytes_accessed=(x.size * itemsize + t.size * 4 + 2 * N * G * C * L * 4),
    )

    s_part, a_part = pl.pallas_call(
        functools.partial(_wce_partials_kernel, ignore_index=ignore_index),
        out_shape=(out_sds, out_sds),
        grid=(N, G),
        in_specs=[
            pl.BlockSpec((1, C, Rc, L), lambda n, g: (n, 0, g, 0)),   # logits slab
            pl.BlockSpec((1, Rc, L), lambda n, g: (n, g, 0)),         # target slab
        ],
        out_specs=(out_spec, out_spec),
        compiler_params=pltpu.CompilerParams(
            # Every grid step writes its own output block -> fully parallel grid.
            dimension_semantics=("parallel", "parallel"),
            vmem_limit_bytes=vmem_limit_bytes,
        ),
        cost_estimate=cost,
    )(x, t)

    # Tiny epilogue in plain JAX: cross-lane / cross-block reduce + weight formula.
    S = jnp.sum(s_part, axis=(0, 1, 3))        # (C,) total softmax mass per class
    A = jnp.sum(a_part, axis=(0, 1, 3))        # (C,) sum of -logp at target, per class
    # Remove the exactly-uniform softmax mass contributed by zero-padded positions.
    S = S - jnp.float32(N * (P_pad - P)) / jnp.float32(C)

    total_positions = jnp.float32(N * P)       # columns of flatten(): N * prod(spatial)
    weight = (total_positions - S) / S         # nominator / denominator (detach is a no-op in fwd)

    # K depends only on targets: per-class count of valid (non-ignored) targets.
    valid = (target != ignore_index)
    cls_ids = jnp.arange(C, dtype=jnp.int32)
    K = jnp.sum(((target.astype(jnp.int32)[..., None] == cls_ids) & valid[..., None])
                .astype(jnp.float32),
                axis=tuple(range(target.ndim)))

    return jnp.sum(weight * A) / jnp.sum(weight * K)


def _reference_wce(logits, target, ignore_index=-1):
    """Pure-JAX reference matching the PyTorch WeightedCrossEntropyLoss.forward."""
    C = logits.shape[1]
    probs = jax.nn.softmax(logits, axis=1)
    flat = jnp.moveaxis(probs, 1, 0).reshape(C, -1)           # flatten(): (C, N*spatial)
    w = (1.0 - flat).sum(-1) / flat.sum(-1)
    logp = jax.nn.log_softmax(logits, axis=1)
    valid = (target != ignore_index)
    tc = jnp.where(valid, target, 0)
    lp_t = jnp.take_along_axis(logp, tc[:, None], axis=1)[:, 0]
    wt = w[tc] * valid.astype(jnp.float32)
    return -(wt * lp_t).sum() / wt.sum()


if __name__ == "__main__":
    root = jax.random.PRNGKey(0)
    k1, k2, k3, k4, k5, k6 = jax.random.split(root, 6)

    # Case 1: lane-aligned spatial (16*16 = 2*128), exercises ignore_index.
    N, C, H, W = 2, 4, 16, 16
    logits1 = jax.random.normal(k1, (N, C, H, W), dtype=jnp.float32)
    target1 = jax.random.randint(k2, (N, H, W), 0, C, dtype=jnp.int32)
    target1 = target1.at[0, 0, :5].set(-1)
    out1 = jax.block_until_ready(weighted_cross_entropy_loss(logits1, target1))
    ref1 = _reference_wce(logits1, target1)
    assert jnp.allclose(out1, ref1, rtol=2e-5, atol=1e-6), (out1, ref1)

    # Case 2: spatial not a multiple of 128 -> lane-padding path.
    N2, C2, H2, W2 = 2, 4, 7, 9
    logits2 = jax.random.normal(k3, (N2, C2, H2, W2), dtype=jnp.float32)
    target2 = jax.random.randint(k4, (N2, H2, W2), 0, C2, dtype=jnp.int32)
    target2 = target2.at[1, 2, :3].set(-1)
    out2 = jax.block_until_ready(weighted_cross_entropy_loss(logits2, target2))
    ref2 = _reference_wce(logits2, target2)
    assert jnp.allclose(out2, ref2, rtol=2e-5, atol=1e-6), (out2, ref2)

    # Case 3: tiny VMEM budget forces row-chunking + row padding (multiple-of-8 blocks).
    N3, C3, D3, H3, W3 = 1, 4, 3, 41, 11       # P = 1353 -> 11 lane-rows
    logits3 = jax.random.normal(k5, (N3, C3, D3, H3, W3), dtype=jnp.float32)
    target3 = jax.random.randint(k6, (N3, D3, H3, W3), 0, C3, dtype=jnp.int32)
    out3 = jax.block_until_ready(
        weighted_cross_entropy_loss(logits3, target3,
                                    live_vmem_budget_bytes=128 * 1024))
    ref3 = _reference_wce(logits3, target3)
    assert jnp.allclose(out3, ref3, rtol=2e-5, atol=1e-6), (out3, ref3)

    print("KERNEL_OK")
</pallas_src>

<mosaic_0001>
module attributes {stable_mosaic.version = 11 : i64} {
  func.func @_wce_partials_kernel(%arg0: i32, %arg1: i32, %arg2: memref<1x4x2x128xf32, #tpu.memory_space<vmem>>, %arg3: memref<1x2x128xi32, #tpu.memory_space<vmem>>, %arg4: memref<1x1x4x128xf32, #tpu.memory_space<vmem>>, %arg5: memref<1x1x4x128xf32, #tpu.memory_space<vmem>>) attributes {dimension_semantics = [#tpu.dimension_semantics<parallel>, #tpu.dimension_semantics<parallel>], iteration_bounds = array<i64: 2, 1>, scalar_prefetch = 0 : i64, scratch_operands = 0 : i64, tpu.core_type = #tpu.core_type<tc>, window_params = [{transform_indices = @transform_0, window_bounds = array<i64: 1, 4, 2, 128>}, {transform_indices = @transform_1, window_bounds = array<i64: 1, 2, 128>}, {transform_indices = @transform_2, window_bounds = array<i64: 1, 1, 4, 128>}, {transform_indices = @transform_3, window_bounds = array<i64: 1, 1, 4, 128>}]} {
    %c0 = arith.constant 0 : index
    %c0_0 = arith.constant 0 : index
    %c0_1 = arith.constant 0 : index
    %c0_2 = arith.constant 0 : index
    %0 = vector.load %arg2[%c0, %c0_0, %c0_1, %c0_2] : memref<1x4x2x128xf32, #tpu.memory_space<vmem>>, vector<1x4x2x128xf32>
    %1 = vector.shape_cast %0 : vector<1x4x2x128xf32> to vector<4x2x128xf32>
    %c0_3 = arith.constant 0 : index
    %c0_4 = arith.constant 0 : index
    %c0_5 = arith.constant 0 : index
    %2 = vector.load %arg3[%c0_3, %c0_4, %c0_5] : memref<1x2x128xi32, #tpu.memory_space<vmem>>, vector<1x2x128xi32>
    %3 = vector.shape_cast %2 : vector<1x2x128xi32> to vector<2x128xi32>
    %cst = arith.constant dense<0xFF800000> : vector<2x128xf32>
    %4 = vector.multi_reduction <maximumf>, %1, %cst [0] : vector<4x2x128xf32> to vector<2x128xf32>
    %5 = vector.shape_cast %4 : vector<2x128xf32> to vector<1x2x128xf32>
    %6 = vector.broadcast %5 : vector<1x2x128xf32> to vector<4x2x128xf32>
    %7 = arith.subf %1, %6 : vector<4x2x128xf32>
    %8 = math.exp %7 : vector<4x2x128xf32>
    %cst_6 = arith.constant dense<0.000000e+00> : vector<2x128xf32>
    %9 = vector.multi_reduction <add>, %8, %cst_6 [0] : vector<4x2x128xf32> to vector<2x128xf32>
    %10 = tpu.reciprocal %9 : vector<2x128xf32> -> vector<2x128xf32>
    %11 = vector.shape_cast %10 : vector<2x128xf32> to vector<1x2x128xf32>
    %12 = vector.broadcast %11 : vector<1x2x128xf32> to vector<4x2x128xf32>
    %13 = arith.mulf %8, %12 : vector<4x2x128xf32>
    %14 = math.log %9 : vector<2x128xf32>
    %15 = tpu.iota {dimensions = array<i32: 0>} : vector<4x1x128xi32>
    %16 = vector.shape_cast %3 : vector<2x128xi32> to vector<1x2x128xi32>
    %17 = vector.broadcast %15 : vector<4x1x128xi32> to vector<4x2x128xi32>
    %18 = vector.broadcast %16 : vector<1x2x128xi32> to vector<4x2x128xi32>
    %19 = arith.cmpi eq, %17, %18 : vector<4x2x128xi32>
    %20 = vector.shape_cast %3 : vector<2x128xi32> to vector<1x2x128xi32>
    %c-1_i32 = arith.constant -1 : i32
    %21 = vector.broadcast %c-1_i32 : i32 to vector<1x2x128xi32>
    %22 = arith.cmpi ne, %20, %21 : vector<1x2x128xi32>
    %23 = vector.broadcast %22 : vector<1x2x128xi1> to vector<4x2x128xi1>
    %24 = arith.andi %19, %23 : vector<4x2x128xi1>
    %cst_7 = arith.constant dense<0.000000e+00> : vector<4x128xf32>
    %25 = vector.multi_reduction <add>, %13, %cst_7 [1] : vector<4x2x128xf32> to vector<4x128xf32>
    %c0_8 = arith.constant 0 : index
    %c0_9 = arith.constant 0 : index
    %c0_10 = arith.constant 0 : index
    %c0_11 = arith.constant 0 : index
    %26 = vector.load %arg4[%c0_8, %c0_9, %c0_10, %c0_11] : memref<1x1x4x128xf32, #tpu.memory_space<vmem>>, vector<1x1x4x128xf32>
    %27 = vector.shape_cast %26 : vector<1x1x4x128xf32> to vector<4x128xf32>
    %28 = vector.shape_cast %25 : vector<4x128xf32> to vector<1x1x4x128xf32>
    tpu.vector_store %arg4[%c0_8, %c0_9, %c0_10, %c0_11], %28 {strides = array<i32>} : memref<1x1x4x128xf32, #tpu.memory_space<vmem>>, vector<1x1x4x128xf32>,
    %29 = vector.shape_cast %14 : vector<2x128xf32> to vector<1x2x128xf32>
    %30 = vector.broadcast %29 : vector<1x2x128xf32> to vector<4x2x128xf32>
    %31 = arith.subf %30, %7 : vector<4x2x128xf32>
    %cst_12 = arith.constant 0.000000e+00 : f32
    %32 = vector.broadcast %cst_12 : f32 to vector<4x2x128xf32>
    %33 = arith.select %24, %31, %32 : vector<4x2x128xi1>, vector<4x2x128xf32>
    %cst_13 = arith.constant dense<0.000000e+00> : vector<4x128xf32>
    %34 = vector.multi_reduction <add>, %33, %cst_13 [1] : vector<4x2x128xf32> to vector<4x128xf32>
    %c0_14 = arith.constant 0 : index
    %c0_15 = arith.constant 0 : index
    %c0_16 = arith.constant 0 : index
    %c0_17 = arith.constant 0 : index
    %35 = vector.load %arg5[%c0_14, %c0_15, %c0_16, %c0_17] : memref<1x1x4x128xf32, #tpu.memory_space<vmem>>, vector<1x1x4x128xf32>
    %36 = vector.shape_cast %35 : vector<1x1x4x128xf32> to vector<4x128xf32>
    %37 = vector.shape_cast %34 : vector<4x128xf32> to vector<1x1x4x128xf32>
    tpu.vector_store %arg5[%c0_14, %c0_15, %c0_16, %c0_17], %37 {strides = array<i32>} : memref<1x1x4x128xf32, #tpu.memory_space<vmem>>, vector<1x1x4x128xf32>,
    return
  }
  func.func @transform_0(%arg0: i32, %arg1: i32) -> (i32, i32, i32, i32) {
    %c0_i32 = arith.constant 0 : i32
    %c0_i32_0 = arith.constant 0 : i32
    %c0_i32_1 = arith.constant 0 : i32
    return %arg0, %c0_i32, %arg1, %c0_i32_0 : i32, i32, i32, i32
  }
  func.func @transform_1(%arg0: i32, %arg1: i32) -> (i32, i32, i32) {
    %c0_i32 = arith.constant 0 : i32
    %c0_i32_0 = arith.constant 0 : i32
    return %arg0, %arg1, %c0_i32 : i32, i32, i32
  }
  func.func @transform_2(%arg0: i32, %arg1: i32) -> (i32, i32, i32, i32) {
    %c0_i32 = arith.constant 0 : i32
    %c0_i32_0 = arith.constant 0 : i32
    %c0_i32_1 = arith.constant 0 : i32
    return %arg0, %arg1, %c0_i32, %c0_i32_0 : i32, i32, i32, i32
  }
  func.func @transform_3(%arg0: i32, %arg1: i32) -> (i32, i32, i32, i32) {
    %c0_i32 = arith.constant 0 : i32
    %c0_i32_0 = arith.constant 0 : i32
    %c0_i32_1 = arith.constant 0 : i32
    return %arg0, %arg1, %c0_i32, %c0_i32_0 : i32, i32, i32, i32
  }
}

</mosaic_0001>

<bundles_post_ra>
// kernel: tpu_custom_call.1
= control target key start
LH: loop header
LB: loop body
LE: loop exit
PB: predicated region body
PF: predicated region fallthrough
CT: control target
= control target key end

     0   :  { %9 = vsyncpa [#allocation3], 0  ;;  %s1208_s0 = inlined_call_operand.hbm [shape: f32[2,4,2,128], index: 0, kind: input, shape index: {}]   ;;  %s1209_s1 = inlined_call_operand.hbm [shape: s32[2,2,128], index: 1, kind: input, shape index: {}]   ;;  %s1210_s2 = inlined_call_operand.hbm [shape: f32[2,1,4,128], index: 2, kind: output, shape index: {0}]   ;;  %s1211_s3 = inlined_call_operand.hbm [shape: f32[2,1,4,128], index: 3, kind: output, shape index: {1}]  }
   0x1   :  { %11 = vsyncpa [#allocation3 + $0x1], 0 }
   0x2   :  { %12 = vsyncpa [#allocation6], 0 }
   0x3   :  { %14 = vsyncpa [#allocation6 + $0x1], 0 }
   0x4   :  { %15 = vsyncpa [#allocation4], 0 }
   0x5   :  { %17 = vsyncpa [#allocation4 + $0x1], 0 }
   0x6   :  { %18 = vsyncpa [#allocation9], 0 }
   0x7   :  { %20 = vsyncpa [#allocation9 + $0x1], 0  ;;  %s879_s12 = smov 0   ;;  %s881_s13 = smov 0  }
   0x8   :  { %s883_s14 = smov 0   ;;  %s885_s15 = smov 0  }
   0x9   :  { %s887_s16 = smov 0   ;;  %s889_s17 = smov 0  }
   0xa LB: > { %s566_s18 = sadd.s32 4294967295, %s851_s17   ;;  %s567_s19 = sadd.s32 4294967294, %s851_s17   ;;  %s851_s17 = sphi %s889_s17, %s26_s17   ;;  %s847_s16 = sphi %s887_s16, %s1238_s16   ;;  %s843_s15 = sphi %s885_s15, %s1237_s15   ;;  %s839_s14 = sphi %s883_s14, %s1236_s14   ;;  %s835_s13 = sphi %s881_s13, %s1235_s13   ;;  %s831_s12 = sphi %s879_s12, %s1234_s12  }
   0xb   : > { %s38_s20 = sadd.s32 1, %s847_s16  ;;  %s47_s21 = sadd.s32 1, %s839_s14 }
   0xc   : > { %p40_p0 = scmp.ge.s32.totalorder %s38_s20, 2  ;;  %p54_p1 = scmp.ne.s32.totalorder %s839_s14, %s835_s13 }
   0xd   : > { %p55_p2 = scmp.eq.s32.totalorder %s851_s17, 0  ;;  %p60_p3 = scmp.ne.s32.totalorder %s835_s13, %s831_s12 }
   0xe   : > { %s1240_s20 = smov (%p40_p0, %s38_s20), 0  ;;  %p61_p5 = scmp.eq.s32.totalorder %s566_s18, 0 }
   0xf   : > { %p920_p4 = por %p55_p2, %p54_p1  ;;  %s42_s23 = ssub.s32 %s847_s16, %s1240_s20 }
  0x10   : > { %p114_p6 = scmp.eq.s32.totalorder %s566_s18, 1  ;;  %p45_p7 = scmp.eq.s32.totalorder %s42_s23, 0 }
  0x11   : > { %p926_p8 = por %p61_p5, %p60_p3  ;;  %p120_p10 = scmp.eq.s32.totalorder %s567_s19, 1 }
  0x12   : > { %p930_p9 = por %p114_p6, %p54_p1  ;;  %p609_p13 = scmp.lt.s32.totalorder %s851_s17, 2 }
  0x13   : > { %s1215_s24 = scalar_select %p926_p8, 1, 0 }
  0x14   : > { %s1216_s25 = scalar_select %p930_p9, 1, 0 }
  0x15   : > { %s935_s26 = scalar_select %p45_p7, %s839_s14, %s47_s21  }
  0x16   : > { %p937_p11 = por %p120_p10, %p60_p3  ;;  %s944_s28 = sand.u32 1, %s839_s14  }
  0x17   : > { %s570_s29 = sshll.u32 %s944_s28, 3  ;;  %s586_s30 = sshll.u32 %s847_s16, 7 }
  0x18   : > { %s1217_s27 = scalar_select %p937_p11, 1, 0 }
  0x19   : > { %s951_s6 = scalar_lea.hbm %s1208_s0, %s586_s30  ;;  %s172_s7 = scalar_lea.vmem [#allocation2], %s570_s29 }
  0x1a   : > { %s180_s8 = sshll.u32 %s172_s7, 4  ;;  %p957_p0 = pnand %p609_p13, %p920_p4  ;;  %s953_s8 = int_to_ptr.vmem [resolvable:$true] %s180_s8 }
  0x1b   : > { %s169_s10 = scalar_lea.sflag [#allocation3], %s944_s28  ;;  %s673_s11 = scalar_lea.hbm %s951_s6, 128 }
  0x1c   : > { %p674_p2 = scmp.ne.s32.totalorder %s951_s6, %s673_s11  ;;  %p675_p3 = pneg %p957_p0 }
  0x1d   : > { %s678_s21 = scalar_lea.hbm %s1208_s0, 256  ;;  %p679_p4 = scmp.lt.u32.totalorder %s951_s6, %s1208_s0 }
  0x1e   : > { %p676_p5 = pnand %p675_p3, %p674_p2  ;;  %p680_p7 = scmp.lt.u32.totalorder %s678_s21, %s673_s11 }
  0x1f   : > { %p682_p13 = scmp.lt.u32.totalorder %s673_s11, %s951_s6 }
  0x20   : > { %p677_p6 = pneg %p676_p5  ;;  %p681_p10 = por %p680_p7, %p679_p4 }
  0x22   : > { %p683_p12 = por %p682_p13, %p681_p10 }
  0x24   : > { %p684_p1 = pnand %p683_p12, %p677_p6 }
  0x26   : > { %687 = shalt.err (!%p684_p1)
}
  0x27   : > { %s688_s29 = scalar_lea.vmem %s953_s8, 128  ;;  %s853_s30 = smov [#allocation2]  }
  0x28   : > { %p689_p2 = scmp.ne.s32.totalorder %s953_s8, %s688_s29  ;;  %s693_s4 = sshll.u32 %s853_s30, 4  ;;  %s694_s4 = int_to_ptr.vmem [resolvable:$false] %s693_s4 }
  0x29   : > { %s695_s5 = scalar_lea.vmem %s694_s4, 256  ;;  %p696_p9 = scmp.lt.s32.totalorder %s953_s8, %s694_s4 }
  0x2a   : > { %p691_p5 = pnand %p689_p2, %p675_p3  ;;  %p697_p4 = scmp.lt.s32.totalorder %s695_s5, %s688_s29 }
  0x2c   : > { %p692_p11 = pneg %p691_p5  ;;  %p698_p7 = por %p697_p4, %p696_p9 }
  0x2e   : > { %p699_p10 = pnand %p698_p7, %p692_p11 }
  0x30   : > { %702 = shalt.err (!%p699_p10)
}
  0x31   : > { %s854_s7 = smov 32   ;;  %s855_s11 = smov 2  }
  0x32   : > { %598 = dma.hbm_to_vmem [thread:$0]  (!%p957_p0), %s951_s6, 128, %s953_s8, %s169_s10, %s854_s7, %s854_s7, %s855_s11  }
  0x33   : > { %p207_p12 = scmp.lt.s32.totalorder %s851_s17, 3  ;;  %s573_s18 = sshll.u32 %s944_s28, 1 }
  0x34   : > { %s574_s19 = sshll.u32 %s847_s16, 5  ;;  %p1219_p9 = scmp.ge.s32.totalorder %s851_s17, 1 }
  0x35   : > { %s1002_s29 = scalar_lea.hbm %s1209_s1, %s574_s19  ;;  %s194_s30 = scalar_lea.vmem [#allocation5], %s573_s18 }
  0x36   : > { %p995_p11 = pnand %p1219_p9, %p207_p12  ;;  %s202_s4 = sshll.u32 %s194_s30, 4  ;;  %s203_s4 = int_to_ptr.vmem [resolvable:$true] %s202_s4 }
  0x37   : > { %s191_s6 = scalar_lea.sflag [#allocation6], %s944_s28  ;;  %s703_s8 = scalar_lea.hbm %s1002_s29, 32 }
  0x38   : > { %s1220_s21 = scalar_select %p995_p11, 1, 0 }
  0x39   : > { %p704_p1 = scmp.ne.s32.totalorder %s1002_s29, %s703_s8  ;;  %s708_s7 = scalar_lea.hbm %s1209_s1, 64 }
  0x3a   : > { %p709_p2 = scmp.lt.u32.totalorder %s1002_s29, %s1209_s1  ;;  %p710_p5 = scmp.lt.u32.totalorder %s708_s7, %s703_s8 }
  0x3b   : > { %p706_p6 = pnand %p704_p1, %p675_p3  ;;  %p712_p7 = scmp.lt.u32.totalorder %s703_s8, %s1002_s29 }
  0x3c   : > { %p711_p4 = por %p710_p5, %p709_p2 }
  0x3d   : > { %p707_p13 = pneg %p706_p6 }
  0x3e   : > { %p713_p10 = por %p712_p7, %p711_p4 }
  0x40   : > { %p714_p12 = pnand %p713_p10, %p707_p13 }
  0x42   : > { %717 = shalt.err (!%p714_p12)
}
  0x43   : > { %s718_s28 = scalar_lea.vmem %s203_s4, 32  ;;  %s856_s18 = smov [#allocation5]  }
  0x44   : > { %p719_p9 = scmp.ne.s32.totalorder %s203_s4, %s718_s28  ;;  %s723_s22 = sshll.u32 %s856_s18, 4  ;;  %s724_s22 = int_to_ptr.vmem [resolvable:$false] %s723_s22 }
  0x45   : > { %s725_s23 = scalar_lea.vmem %s724_s22, 64  ;;  %p726_p8 = scmp.lt.s32.totalorder %s203_s4, %s724_s22 }
  0x46   : > { %p721_p1 = pnand %p719_p9, %p675_p3  ;;  %p727_p11 = scmp.lt.s32.totalorder %s725_s23, %s718_s28 }
  0x48   : > { %p722_p6 = pneg %p721_p1  ;;  %p728_p2 = por %p727_p11, %p726_p8 }
  0x4a   : > { %p729_p5 = pnand %p728_p2, %p722_p6 }
  0x4c   : > { %732 = shalt.err (!%p729_p5)
}
  0x4d   : > { %601 = dma.hbm_to_vmem [thread:$0]  (!%p957_p0), %s1002_s29, 32, %s203_s4, %s191_s6  }
  0x4e   : > { %p1221_p13 = scmp.ne.s32.totalorder %s1220_s21, 0 }
  0x4f   : > { %s1027_s30 = sand.u32 (!%p1221_p13), 1, %s835_s13   ;;  %p1222_p3 = scmp.ne.s32.totalorder (!%p1221_p13), %s1215_s24, 0 }
  0x50   : > { %211 = sbr.rel (%p1221_p13) target bundleno = 188 (0xbc), region = 28  ;;  %s576_s8 = sshll.u32 (!%p1221_p13), %s1027_s30, 3 }
  0x51   : > { %s214_s10 = scalar_lea.sflag (!%p1221_p13), [#allocation3], %s1027_s30  ;;  %s217_s5 = scalar_lea.vmem (!%p1221_p13), [#allocation2], %s576_s8 }
  0x57   : > { %814 = dma.done.wait (%p1222_p3), %s214_s10, 128  }
  0x58   : > { %816 = vsyncadd (%p1222_p3), %s214_s10, 4294967168  ;;  %s577_s9 = sshll.u32 %s1027_s30, 1  ;;  %s223_s21 = scalar_lea.sflag [#allocation6], %s1027_s30 }
  0x59   : > { %s1037_s29 = scalar_lea.vmem [#allocation5], %s577_s9 }
  0x5a   : > { %818 = dma.done.wait (%p1222_p3), %s223_s21, 32  }
  0x5b   : > { %820 = vsyncadd (%p1222_p3), %s223_s21, 4294967264  ;;  %vm264_vm0 = vcmask 1041408   ;;  %v259_v0 = vld [vmem:[%s217_s5] sm:$0x3]  ;;  %v260_v1 = vld [vmem:[%s217_s5 + $0x2] sm:$0x3] }
  0x5c   : > { %v261_v2 = vld [vmem:[%s217_s5 + $0x4] sm:$0x3]  ;;  %v262_v3 = vld [vmem:[%s217_s5 + $0x6] sm:$0x3]  ;;  %v265_v4 = vsel %vm264_vm0, %v259_v0, -inf  ;;  %v266_v5 = vsel %vm264_vm0, %v260_v1, -inf }
  0x5d   : > { %v267_v6 = vsel %vm264_vm0, %v261_v2, -inf  ;;  %v268_v7 = vsel %vm264_vm0, %v262_v3, -inf  ;;  %v269_v8 = vmax.f32 %v265_v4, %v266_v5  ;;  %v263_v30 = vld [vmem:[%s1037_s29] sm:$0x3]  ;;  %vm341_vm10 = vcmask 1041409   ;;  %s578_s24 = sshll.u32 %s1027_s30, 2 }
  0x5e   : > { %v270_v9 = vmax.f32 %v267_v6, %v268_v7  ;;  %vm298_vm1 = vcmp.eq.s32.totalorder %v263_v30, 0  ;;  %vm302_vm2 = vcmp.ne.s32.totalorder %v263_v30, 4294967295  ;;  %vm299_vm3 = vcmp.eq.s32.totalorder %v263_v30, 1  ;;  %s251_s4 = scalar_lea.vmem [#allocation7], %s578_s24  ;;  %s582_s7 = sshll.u32 %s843_s15, 6 }
  0x5f   : > { %vm300_vm4 = vcmp.eq.s32.totalorder %v263_v30, 2  ;;  %vm301_vm5 = vcmp.eq.s32.totalorder %v263_v30, 3  ;;  %vm1065_vm6 = vmand %vm298_vm1, %vm302_vm2  ;;  %vm343_vm11 = vcmask 1042434   ;;  %vm345_vm12 = vcmask 1043459   ;;  %s414_s6 = sshll.u32 %s251_s4, 4  ;;  %s1118_s28 = scalar_lea.hbm %s1210_s2, %s582_s7  ;;  %s1110_s6 = int_to_ptr.vmem [resolvable:$true] %s414_s6 }
  0x60   : > { %v271_v10 = vmax.f32 %v269_v8, %v270_v9  ;;  %vm1070_vm7 = vmand %vm299_vm3, %vm302_vm2  ;;  %s1123_s18 = scalar_lea.vmem [#allocation8], %s578_s24  ;;  %s395_s23 = scalar_lea.sflag [#allocation4], %s1027_s30 }
  0x61   : > { %vm1079_vm8 = vmand %vm300_vm4, %vm302_vm2  ;;  %s428_s22 = sshll.u32 %s1123_s18, 4  ;;  %s733_s8 = scalar_lea.vmem %s1110_s6, 64  ;;  %s1151_s22 = int_to_ptr.vmem [resolvable:$true] %s428_s22 }
  0x62   : > { %v1047_v11 = vsub.f32 %v259_v0, %v271_v10  ;;  %v1049_v12 = vsub.f32 %v260_v1, %v271_v10  ;;  %v1051_v13 = vsub.f32 %v261_v2, %v271_v10  ;;  %v1053_v14 = vsub.f32 %v262_v3, %v271_v10  ;;  %vm1085_vm9 = vmand %vm301_vm5, %vm302_vm2  ;;  %p734_p8 = scmp.ne.s32.totalorder %s1110_s6, %s733_s8  ;;  %p1231_p0 = scmp.ne.s32.totalorder %s1216_s25, 0 }
  0x63   : > { %s857_s10 = smov [#allocation7]  }
  0x64   : > { %v276_v15 = vmul.f32 1.442695, %v1047_v11  ;;  %v278_v16 = vmul.f32 1.442695, %v1049_v12  ;;  %v280_v17 = vmul.f32 1.442695, %v1051_v13  ;;  %p735_p11 = pnand %p734_p8, %p1231_p0 }
  0x65   : > { %v282_v18 = vmul.f32 1.442695, %v1053_v14  ;;  %s737_s5 = sshll.u32 %s857_s10, 4  ;;  %s738_s5 = int_to_ptr.vmem [resolvable:$false] %s737_s5 }
  0x66   : > { %661 = vpow2.f32 %v276_v15  ;;  %p736_p4 = pneg %p735_p11  ;;  %s739_s9 = scalar_lea.vmem %s738_s5, 128 }
  0x67   : > { %663 = vpow2.f32 %v278_v16  ;;  %p740_p7 = scmp.lt.s32.totalorder %s1110_s6, %s738_s5  ;;  %p741_p10 = scmp.lt.s32.totalorder %s739_s9, %s733_s8 }
  0x68   : > { %665 = vpow2.f32 %v280_v17 }
  0x69   : > { %667 = vpow2.f32 %v282_v18  ;;  %p742_p12 = por %p741_p10, %p740_p7 }
  0x6b   : > { %p743_p9 = pnand %p742_p12, %p736_p4 }
  0x70   : > { %v662_v19 = vpop.eup %661 }
  0x71   : > { %v664_v20 = vpop.eup %663  ;;  %v284_v21 = vsel %vm264_vm0, %v662_v19, 0.0 }
  0x72   : > { %v666_v22 = vpop.eup %665  ;;  %v285_v23 = vsel %vm264_vm0, %v664_v20, 0.0 }
  0x73   : > { %v668_v24 = vpop.eup %667  ;;  %v286_v25 = vadd.f32 %v285_v23, %v284_v21  ;;  %v287_v26 = vsel %vm264_vm0, %v666_v22, 0.0 }
  0x74   : > { %v289_v27 = vsel %vm264_vm0, %v668_v24, 0.0 }
  0x75   : > { %v288_v28 = vadd.f32 %v287_v26, %v286_v25 }
  0x77   : > { %v290_v29 = vadd.f32 %v289_v27, %v288_v28 }
  0x79   : > { %669 = vrcp.f32 %v290_v29 }
  0x7a   : > { %671 = vlog2.f32 %v290_v29 }
  0x83   : > { %v670_v31 = vpop.eup %669 }
  0x84   : > { %v672_v32 = vpop.eup %671  ;;  %v292_v33 = vmul.f32 %v670_v31, %v662_v19  ;;  %v293_v34 = vmul.f32 %v670_v31, %v664_v20  ;;  %v294_v35 = vmul.f32 %v670_v31, %v666_v22  ;;  %v295_v36 = vmul.f32 %v670_v31, %v668_v24 }
  0x85   : > { %v297_v38 = vmul.f32 0.6931472, %v672_v32 }
  0x86   : > { %v309_v40 = vsel %vm264_vm0, %v292_v33, 0.0  ;;  %v316_v41 = vsel %vm264_vm0, %v293_v34, 0.0  ;;  %v323_v42 = vsel %vm264_vm0, %v294_v35, 0.0  ;;  %v330_v43 = vsel %vm264_vm0, %v295_v36, 0.0 }
  0x87   : > { %v310_v45 = vrot.slane %v309_v40, 4  ;;  %v317_v46 = vrot.slane %v316_v41, 4  ;;  %v324_v47 = vrot.slane %v323_v42, 4  ;;  %v331_v48 = vrot.slane %v330_v43, 4 }
  0x88   : > { %v349_v50 = vsub.f32 %v297_v38, %v1047_v11  ;;  %v350_v51 = vsub.f32 %v297_v38, %v1049_v12  ;;  %v351_v52 = vsub.f32 %v297_v38, %v1051_v13  ;;  %v352_v53 = vsub.f32 %v297_v38, %v1053_v14 }
  0x89   : > { %v311_v54 = vadd.f32 %v310_v45, %v309_v40  ;;  %v318_v55 = vadd.f32 %v317_v46, %v316_v41  ;;  %v325_v56 = vadd.f32 %v324_v47, %v323_v42  ;;  %v332_v57 = vadd.f32 %v331_v48, %v330_v43 }
  0x8a   : > { %v353_v58 = vsel %vm1065_vm6, %v349_v50, 0.0  ;;  %v354_v59 = vsel %vm1070_vm7, %v350_v51, 0.0  ;;  %v355_v60 = vsel %vm1079_vm8, %v351_v52, 0.0  ;;  %v356_v61 = vsel %vm1085_vm9, %v352_v53, 0.0 }
  0x8b   : > { %v312_v62 = vrot.slane %v311_v54, 2  ;;  %v319_v63 = vrot.slane %v318_v55, 2  ;;  %v326_v0 = vrot.slane %v325_v56, 2  ;;  %v333_v1 = vrot.slane %v332_v57, 2 }
  0x8c   : > { %v357_v2 = vsel %vm264_vm0, %v353_v58, 0.0  ;;  %v364_v3 = vsel %vm264_vm0, %v354_v59, 0.0  ;;  %v371_v4 = vsel %vm264_vm0, %v355_v60, 0.0  ;;  %v378_v5 = vsel %vm264_vm0, %v356_v61, 0.0 }
  0x8d   : > { %v313_v6 = vadd.f32 %v312_v62, %v311_v54  ;;  %v320_v7 = vadd.f32 %v319_v63, %v318_v55  ;;  %v327_v8 = vadd.f32 %v326_v0, %v325_v56  ;;  %v334_v9 = vadd.f32 %v333_v1, %v332_v57 }
  0x8e   : > { %v358_v10 = vrot.slane %v357_v2, 4  ;;  %v365_v11 = vrot.slane %v364_v3, 4  ;;  %v372_v12 = vrot.slane %v371_v4, 4  ;;  %v379_v13 = vrot.slane %v378_v5, 4 }
  0x8f   : > { %v314_v14 = vrot.slane %v313_v6, 1  ;;  %v321_v15 = vrot.slane %v320_v7, 1  ;;  %v328_v16 = vrot.slane %v327_v8, 1  ;;  %v335_v17 = vrot.slane %v334_v9, 1 }
  0x90   : > { %v359_v18 = vadd.f32 %v358_v10, %v357_v2  ;;  %v366_v19 = vadd.f32 %v365_v11, %v364_v3  ;;  %v373_v20 = vadd.f32 %v372_v12, %v371_v4  ;;  %v380_v21 = vadd.f32 %v379_v13, %v378_v5 }
  0x91   : > { %v315_v22 = vadd.f32 %v314_v14, %v313_v6  ;;  %v322_v23 = vadd.f32 %v321_v15, %v320_v7  ;;  %v329_v24 = vadd.f32 %v328_v16, %v327_v8  ;;  %v336_v25 = vadd.f32 %v335_v17, %v334_v9 }
  0x92   : > { %v360_v26 = vrot.slane %v359_v18, 2  ;;  %v367_v27 = vrot.slane %v366_v19, 2  ;;  %v374_v28 = vrot.slane %v373_v20, 2  ;;  %v381_v29 = vrot.slane %v380_v21, 2 }
  0x93   : > { %v342_v30 = vsel %vm341_vm10, %v322_v23, %v315_v22 }
  0x94   : > { %v344_v31 = vsel %vm343_vm11, %v329_v24, %v342_v30  ;;  %v361_v32 = vadd.f32 %v360_v26, %v359_v18  ;;  %v368_v33 = vadd.f32 %v367_v27, %v366_v19  ;;  %v375_v34 = vadd.f32 %v374_v28, %v373_v20 }
  0x95   : > { %v346_v35 = vsel %vm345_vm12, %v336_v25, %v344_v31  ;;  %v382_v36 = vadd.f32 %v381_v29, %v380_v21 }
  0x96   : > { %348 = vst [vmem:[%s251_s4] sm:$0xf] %v346_v35  ;;  %v362_v37 = vrot.slane %v361_v32, 1  ;;  %v369_v38 = vrot.slane %v368_v33, 1  ;;  %v376_v39 = vrot.slane %v375_v34, 1 }
  0x97   : > { %v383_v40 = vrot.slane %v382_v36, 1 }
  0x98   : > { %746 = shalt.err (!%p743_p9)
}
  0x99   : > { %s747_s21 = scalar_lea.hbm %s1118_s28, 64  ;;  %s751_s4 = scalar_lea.hbm %s1210_s2, 128 }
  0x9a   : > { %p748_p1 = scmp.ne.s32.totalorder %s1118_s28, %s747_s21  ;;  %p752_p5 = scmp.lt.u32.totalorder %s1118_s28, %s1210_s2 }
  0x9b   : > { %p753_p13 = scmp.lt.u32.totalorder %s751_s4, %s747_s21  ;;  %p755_p8 = scmp.lt.u32.totalorder %s747_s21, %s1118_s28 }
  0x9c   : > { %p749_p6 = pnand %p748_p1, %p1231_p0 }
  0x9d   : > { %p754_p3 = por %p753_p13, %p752_p5 }
  0x9e   : > { %p750_p2 = pneg %p749_p6 }
  0x9f   : > { %p756_p11 = por %p755_p8, %p754_p3 }
  0xa1   : > { %p757_p4 = pnand %p756_p11, %p750_p2 }
  0xa3   : > { %760 = shalt.err (!%p757_p4)
}
  0xa4   : > { %591 = dma.vmem_to_hbm [thread:$0]  (%p1231_p0), %s1110_s6, 64, %s1118_s28, %s395_s23   ;;  %v363_v41 = vadd.f32 %v362_v37, %v361_v32  ;;  %v370_v42 = vadd.f32 %v369_v38, %v368_v33  ;;  %v377_v43 = vadd.f32 %v376_v39, %v375_v34  ;;  %v384_v44 = vadd.f32 %v383_v40, %v382_v36 }
  0xa5   : > { %s1159_s5 = scalar_lea.hbm %s1211_s3, %s582_s7  ;;  %s400_s6 = scalar_lea.sflag [#allocation9], %s1027_s30 }
  0xa6   : > { %v389_v45 = vsel %vm341_vm10, %v370_v42, %v363_v41  ;;  %s761_s28 = scalar_lea.vmem %s1151_s22, 64  ;;  %s858_s23 = smov [#allocation8]  }
  0xa7   : > { %v390_v46 = vsel %vm343_vm11, %v377_v43, %v389_v45  ;;  %p762_p7 = scmp.ne.s32.totalorder %s1151_s22, %s761_s28  ;;  %s765_s9 = sshll.u32 %s858_s23, 4  ;;  %s766_s9 = int_to_ptr.vmem [resolvable:$false] %s765_s9 }
  0xa8   : > { %v391_v47 = vsel %vm345_vm12, %v384_v44, %v390_v46  ;;  %s767_s21 = scalar_lea.vmem %s766_s9, 128  ;;  %p768_p9 = scmp.lt.s32.totalorder %s1151_s22, %s766_s9 }
  0xa9   : > { %393 = vst [vmem:[%s1123_s18] sm:$0xf] %v391_v47  ;;  %p763_p10 = pnand %p762_p7, %p1231_p0  ;;  %p769_p1 = scmp.lt.s32.totalorder %s767_s21, %s761_s28 }
  0xab   : > { %p764_p12 = pneg %p763_p10  ;;  %p770_p6 = por %p769_p1, %p768_p9 }
  0xad   : > { %p771_p2 = pnand %p770_p6, %p764_p12 }
  0xaf   : > { %774 = shalt.err (!%p771_p2)
}
  0xb0   : > { %s775_s15 = scalar_lea.hbm %s1159_s5, 64  ;;  %s779_s18 = scalar_lea.hbm %s1211_s3, 128 }
  0xb1   : > { %p776_p5 = scmp.ne.s32.totalorder %s1159_s5, %s775_s15  ;;  %p780_p8 = scmp.lt.u32.totalorder %s1159_s5, %s1211_s3 }
  0xb2   : > { %p781_p11 = scmp.lt.u32.totalorder %s779_s18, %s775_s15  ;;  %p783_p7 = scmp.lt.u32.totalorder %s775_s15, %s1159_s5 }
  0xb3   : > { %p777_p13 = pnand %p776_p5, %p1231_p0 }
  0xb4   : > { %p782_p4 = por %p781_p11, %p780_p8 }
  0xb5   : > { %p778_p3 = pneg %p777_p13 }
  0xb6   : > { %p784_p10 = por %p783_p7, %p782_p4 }
  0xb8   : > { %p785_p12 = pnand %p784_p10, %p778_p3 }
  0xba   : > { %788 = shalt.err (!%p785_p12)
}
  0xbb   : > { %592 = dma.vmem_to_hbm [thread:$0]  (%p1231_p0), %s1151_s22, 64, %s1159_s5, %s400_s6  }
  0xbc PF: > { %s440_s4 = sand.u32 1, %s831_s12   ;;  %p1232_p9 = scmp.ne.s32.totalorder %s1217_s27, 0 }
  0xbd   : > { %p1233_p1 = scmp.ge.s32.totalorder %s851_s17, 2  ;;  %s441_s11 = scalar_lea.sflag [#allocation4], %s440_s4 }
  0xbf   : > { %p603_p6 = pnand %p1233_p1, %p1232_p9 }
  0xc1   : > { %822 = dma.done.wait (!%p603_p6), %s441_s11, 64  }
  0xc2   : > { %824 = vsyncadd (!%p603_p6), %s441_s11, 4294967232  ;;  %s450_s19 = scalar_lea.sflag [#allocation9], %s440_s4 }
  0xc3   : > { %826 = dma.done.wait (!%p603_p6), %s450_s19, 64  }
  0xc4   : > { %828 = vsyncadd (!%p603_p6), %s450_s19, 4294967232  ;;  %s26_s17 = sadd.s32 1, %s851_s17   ;;  %s1234_s12 = smov %s835_s13 }
  0xc5   : > { %p23_p2 = scmp.ge.s32.totalorder %s26_s17, 4   ;;  %s1235_s13 = smov %s839_s14 }
  0xc6   : > { %s1236_s14 = smov %s935_s26  ;;  %s1237_s15 = smov %s847_s16 }
  0xc7   : > { %s1238_s16 = smov %s1240_s20  ;;  %25 = sbr.rel (!%p23_p2) target bundleno = 10 (0xa), region = 103 }
  0xce   :  { %455 = vsyncpa [#allocation3], 1 }
  0xcf   :  { %457 = vsyncpa [#allocation3 + $0x1], 1 }
  0xd0   :  { %458 = vsyncpa [#allocation6], 1 }
  0xd1   :  { %460 = vsyncpa [#allocation6 + $0x1], 1 }
  0xd2   :  { %461 = vsyncpa [#allocation4], 1 }
  0xd3   :  { %463 = vsyncpa [#allocation4 + $0x1], 1 }
  0xd4   :  { %464 = vsyncpa [#allocation9], 1 }
  0xd5   :  { %466 = vsyncpa [#allocation9 + $0x1], 1 }

</bundles_post_ra>
